<compile_context>
chip_gen: v6e
topology: v6e:2x2x1
jax: 0.10.0
libtpu: 0.0.40
codegen_flags: <defaults>
</compile_context>

<pallas_src>
import jax
import jax.numpy as jnp
from jax.experimental import pallas as pl
from jax.experimental.pallas import tpu as pltpu


def _patch_embed_kernel(rows_ref, w_ref, add_ref, out_ref):
    """One grid step: a (Rt, Kp) slab of im2col rows -> (Rt, Ep) embeddings.

    rows_ref: (Rt, Kp)  bf16  im2col patch rows; row 0 of each image is zero
                              (the cls slot).  Rt = block_b * (num_patches+1).
    w_ref:    (Kp, Ep)  bf16  projection weight (K, E zero-padded to 128).
    add_ref:  (Rt, Ep)  f32   per-row additive term: cls_token + pos_embed[0]
                              on cls rows, conv_bias + pos_embed[1:] else.
    out_ref:  (Rt, Ep)        output dtype.
    """
    proj = jnp.dot(rows_ref[...], w_ref[...],
                   preferred_element_type=jnp.float32)
    out_ref[...] = (proj + add_ref[...]).astype(out_ref.dtype)


def patch_embedding_forward(x, conv_w, conv_b, cls_token, pos_embed,
                            patch_size, *, out_dtype=jnp.bfloat16,
                            block_b=None):
    """x: (B, C, H, W) NCHW float32.  Returns (B, num_patches + 1, embed_dim)."""
    B, C, H, W = x.shape
    P = patch_size
    assert H % P == 0 and W % P == 0
    nh, nw = H // P, W // P
    N = nh * nw                       # num_patches
    Np1 = N + 1
    E = conv_w.shape[0]               # embed_dim
    K = C * P * P
    Kp = pl.cdiv(K, 128) * 128        # lane-pad the contraction dim
    Ep = pl.cdiv(E, 128) * 128        # lane-pad the embedding dim

    # --- glue: im2col (== Conv2d stride=P, kernel=P), emitted in bf16 --------
    patches = x.reshape(B, C, nh, P, nw, P)
    patches = patches.transpose(0, 2, 4, 1, 3, 5).reshape(B, N, K)
    patches = patches.astype(jnp.bfloat16)
    # Prepend one zero row per image (cls slot) and pad K -> Kp in one pad op.
    # The zero row makes the cls token an ordinary matmul row, so the kernel
    # writes a single aligned, lane-dense output block (no masked stores).
    patches = jnp.pad(patches, ((0, 0), (1, 0), (0, Kp - K)))
    rows = patches.reshape(B * Np1, Kp)           # contiguous merge -> free

    # conv weight (E, C, P, P) -> (Kp, Ep) bf16 (zero rows/cols are exact).
    w_patch = conv_w.reshape(E, K).T.astype(jnp.bfloat16)
    w_patch = jnp.pad(w_patch, ((0, Kp - K), (0, Ep - E)))

    # Per-row additive term (f32): row 0 = cls + pos[0]; rows 1.. = bias + pos.
    add = jnp.concatenate(
        [(cls_token[0, 0, :] + pos_embed[0, 0, :]).reshape(1, E),
         conv_b[None, :] + pos_embed[0, 1:, :]], axis=0).astype(jnp.float32)
    add = jnp.pad(add, ((0, 0), (0, Ep - E)))                    # (Np1, Ep)

    # --- VMEM budget & block sizing (per-generation) --------------------------
    try:
        info = pltpu.get_tpu_info()
        vmem_cap = int(getattr(info, "vmem_capacity_bytes", 0)) or (64 << 20)
    except Exception:                 # pragma: no cover - interpret/CPU path
        vmem_cap = 64 << 20           # conservative (v7x-sized) fallback
    # Raise the scoped limit past the small defaults (v5e: 16 MiB) but keep
    # headroom below physical capacity for compiler-internal scratch.
    vmem_limit = max(min(vmem_cap * 3 // 4, vmem_cap - (16 << 20)), 32 << 20)
    budget = (vmem_limit * 4) // 5
    out_bytes = jnp.dtype(out_dtype).itemsize

    def _footprint(bb):
        r = bb * Np1
        return (2 * r * Kp * 2          # streamed rows, double-buffered bf16
                + 2 * r * Ep * out_bytes  # streamed output, double-buffered
                + Kp * Ep * 2             # resident weight (single buffer)
                + r * Ep * 4)             # resident additive term (single buf)

    if block_b is None:
        # Valid blocks: whole images with sublane-aligned row count
        # (bb*(N+1) % 8 == 0), or the full batch (block == full array extent).
        cands = [d for d in range(B, 0, -1)
                 if B % d == 0 and ((d * Np1) % 8 == 0 or d == B)]
        multi = [d for d in cands if B // d >= 2 and _footprint(d) <= budget]
        fits = [d for d in cands if _footprint(d) <= budget]
        # Prefer >= 2 grid steps (feeds both v7x TensorCores, overlaps DMA),
        # then the largest block that fits the VMEM budget.
        block_b = (multi or fits or [min(cands)])[0]
    assert B % block_b == 0
    assert (block_b * Np1) % 8 == 0 or block_b == B
    nb = B // block_b
    Rt = block_b * Np1

    add_tiled = jnp.tile(add, (block_b, 1))                      # (Rt, Ep)

    out = pl.pallas_call(
        _patch_embed_kernel,
        out_shape=jax.ShapeDtypeStruct((B * Np1, Ep), out_dtype),
        grid_spec=pltpu.PrefetchScalarGridSpec(
            num_scalar_prefetch=0,
            grid=(nb,),
            in_specs=[
                pl.BlockSpec((Rt, Kp), lambda g: (g, 0)),
                # Constant-index operands: fetched once, single-buffered.
                pl.BlockSpec((Kp, Ep), lambda g: (0, 0),
                             pipeline_mode=pl.Buffered(1)),
                pl.BlockSpec((Rt, Ep), lambda g: (0, 0),
                             pipeline_mode=pl.Buffered(1)),
            ],
            out_specs=pl.BlockSpec((Rt, Ep), lambda g: (g, 0)),
        ),
        compiler_params=pltpu.CompilerParams(
            dimension_semantics=("parallel",),
            vmem_limit_bytes=int(vmem_limit)),
    )(rows, w_patch, add_tiled)

    out = out.reshape(B, Np1, Ep)
    if Ep != E:
        # TODO(synk): standard ViT embed dims (768/1024/1280) hit Ep == E and
        # skip this extra HBM pass; only non-128-multiple dims pay it.
        out = out[..., :E]
    # TODO(synk): nn.Dropout is identity in eval mode; training-mode dropout
    # (random masking) is not implemented here.
    return out


def _reference(x, conv_w, conv_b, cls_token, pos_embed, P):
    """Plain-JAX reference matching the PyTorch module (f32)."""
    B = x.shape[0]
    E = conv_w.shape[0]
    conv = jax.lax.conv_general_dilated(
        x, conv_w, window_strides=(P, P), padding="VALID",
        dimension_numbers=("NCHW", "OIHW", "NCHW"))
    conv = conv + conv_b.reshape(1, E, 1, 1)
    seq = conv.reshape(B, E, -1).transpose(0, 2, 1)
    seq = jnp.concatenate(
        [jnp.broadcast_to(cls_token, (B, 1, E)), seq], axis=1)
    return seq + pos_embed


if __name__ == "__main__":
    # Small ViT-style config: channels=4, image 16x16, patch 4, embed_dim=32
    # -> num_patches = (16/4)^2 = 16.
    P = 4
    C, Hs, Ws = 4, 16, 16
    embed_dim = 32
    num_patches = (Hs // P) * (Ws // P)

    key = jax.random.PRNGKey(0)
    k_x, k_w, k_b, k_cls, k_pos, k_x2 = jax.random.split(key, 6)

    conv_w = jax.random.normal(k_w, (embed_dim, C, P, P), jnp.float32) * 0.05
    conv_b = jax.random.normal(k_b, (embed_dim,), jnp.float32) * 0.05
    # nn.Parameter(torch.zeros(...)) in __init__; use small nonzero values so
    # the add paths are actually exercised.
    cls_token = jax.random.normal(k_cls, (1, 1, embed_dim), jnp.float32) * 0.02
    pos_embed = jax.random.normal(
        k_pos, (1, num_patches + 1, embed_dim), jnp.float32) * 0.02

    fwd = jax.jit(lambda xx, ww, bb, cc, pp: patch_embedding_forward(
        xx, ww, bb, cc, pp, P))

    # Case 1: batch=2 (single grid step; block == full array extent).
    x1 = jax.random.normal(k_x, (2, C, Hs, Ws), jnp.float32)
    out1 = jax.block_until_ready(fwd(x1, conv_w, conv_b, cls_token, pos_embed))
    assert out1.shape == (2, num_patches + 1, embed_dim)
    ref1 = _reference(x1, conv_w, conv_b, cls_token, pos_embed, P)
    # bf16 operands/output (f32 accumulation) -> looser tolerance than f32.
    assert jnp.allclose(out1.astype(jnp.float32), ref1, atol=2e-2, rtol=2e-2)

    # Case 2: batch=16 so the grid has >= 2 steps (exercises the tiled path).
    x2 = jax.random.normal(k_x2, (16, C, Hs, Ws), jnp.float32)
    out2 = jax.block_until_ready(fwd(x2, conv_w, conv_b, cls_token, pos_embed))
    assert out2.shape == (16, num_patches + 1, embed_dim)
    ref2 = _reference(x2, conv_w, conv_b, cls_token, pos_embed, P)
    assert jnp.allclose(out2.astype(jnp.float32), ref2, atol=2e-2, rtol=2e-2)

    print("KERNEL_OK")
</pallas_src>

<mosaic_0001>
module attributes {stable_mosaic.version = 11 : i64} {
  func.func @_patch_embed_kernel(%arg0: i32, %arg1: memref<34x128xbf16, #tpu.memory_space<vmem>>, %arg2: memref<128x128xbf16, #tpu.memory_space<vmem>>, %arg3: memref<34x128xf32, #tpu.memory_space<vmem>>, %arg4: memref<34x128xbf16, #tpu.memory_space<vmem>>) attributes {dimension_semantics = [#tpu.dimension_semantics<parallel>], iteration_bounds = array<i64: 1>, scalar_prefetch = 0 : i64, scratch_operands = 0 : i64, tpu.core_type = #tpu.core_type<tc>, window_params = [{transform_indices = @transform_0, window_bounds = array<i64: 34, 128>}, {pipeline_mode = #tpu.pipeline_mode<synchronous>, transform_indices = @transform_1, window_bounds = array<i64: 128, 128>}, {pipeline_mode = #tpu.pipeline_mode<synchronous>, transform_indices = @transform_2, window_bounds = array<i64: 34, 128>}, {transform_indices = @transform_3, window_bounds = array<i64: 34, 128>}]} {
    %c0 = arith.constant 0 : index
    %c0_0 = arith.constant 0 : index
    %0 = vector.load %arg1[%c0, %c0_0] : memref<34x128xbf16, #tpu.memory_space<vmem>>, vector<34x128xbf16>
    %c0_1 = arith.constant 0 : index
    %c0_2 = arith.constant 0 : index
    %1 = vector.load %arg2[%c0_1, %c0_2] : memref<128x128xbf16, #tpu.memory_space<vmem>>, vector<128x128xbf16>
    %cst = arith.constant dense<0.000000e+00> : vector<34x128xf32>
    %2 = tpu.matmul %0, %1, %cst {dimension_numbers = #tpu.dot_dimension_numbers<[1], [0], [0], [1], [0, 0, 1, 1], [], []>} : vector<34x128xbf16>, vector<128x128xbf16>, vector<34x128xf32> -> vector<34x128xf32>
    %c0_3 = arith.constant 0 : index
    %c0_4 = arith.constant 0 : index
    %3 = vector.load %arg3[%c0_3, %c0_4] : memref<34x128xf32, #tpu.memory_space<vmem>>, vector<34x128xf32>
    %4 = arith.addf %2, %3 : vector<34x128xf32>
    %5 = arith.truncf %4 : vector<34x128xf32> to vector<34x128xbf16>
    %c0_5 = arith.constant 0 : index
    %c0_6 = arith.constant 0 : index
    %6 = vector.load %arg4[%c0_5, %c0_6] : memref<34x128xbf16, #tpu.memory_space<vmem>>, vector<34x128xbf16>
    tpu.vector_store %arg4[%c0_5, %c0_6], %5 {strides = array<i32>} : memref<34x128xbf16, #tpu.memory_space<vmem>>, vector<34x128xbf16>,
    return
  }
  func.func @transform_0(%arg0: i32) -> (i32, i32) {
    %c0_i32 = arith.constant 0 : i32
    %c0_i32_0 = arith.constant 0 : i32
    return %arg0, %c0_i32 : i32, i32
  }
  func.func @transform_1(%arg0: i32) -> (i32, i32) {
    %c0_i32 = arith.constant 0 : i32
    %c0_i32_0 = arith.constant 0 : i32
    %c0_i32_1 = arith.constant 0 : i32
    return %c0_i32, %c0_i32_0 : i32, i32
  }
  func.func @transform_2(%arg0: i32) -> (i32, i32) {
    %c0_i32 = arith.constant 0 : i32
    %c0_i32_0 = arith.constant 0 : i32
    %c0_i32_1 = arith.constant 0 : i32
    return %c0_i32, %c0_i32_0 : i32, i32
  }
  func.func @transform_3(%arg0: i32) -> (i32, i32) {
    %c0_i32 = arith.constant 0 : i32
    %c0_i32_0 = arith.constant 0 : i32
    return %arg0, %c0_i32 : i32, i32
  }
}

</mosaic_0001>

<bundles_post_ra>
// kernel: tile.9
= control target key start
LH: loop header
LB: loop body
LE: loop exit
PB: predicated region body
PF: predicated region fallthrough
CT: control target
= control target key end

     0   :  { %s9_s6 = smov 3  ;;  %s69_s0 = inlined_call_operand.vmem [shape: f32[2,17,128], index: 0, kind: input, shape index: {}]   ;;  %s70_s1 = inlined_call_operand.vmem [shape: f32[34,128], index: 1, kind: output, shape index: {}]  }
   0x1   :  { %v2_v0 = vld [vmem:[%s69_s0] sm:$0xff]   ;;  %v21_v1 = vld [vmem:[%s69_s0 + $0x8] sm:$0xff]  }
   0x2   :  { %v23_v2 = vld [vmem:[%s69_s0 + $0x10] ss:$8 sm:%s9_s6]   ;;  %3 = vst [vmem:[%s70_s1] sm:$0xff] %v2_v0   ;;  %22 = vst [vmem:[%s70_s1 + $0x8] sm:$0xff] %v21_v1  }
   0x3   :  { %24 = vst [vmem:[%s70_s1 + $0x10] sm:$0x3] %v23_v2   ;;  %v25_v3 = vld [vmem:[%s69_s0 + $0x19] sm:$0xff]   ;;  %v27_v4 = vld [vmem:[%s69_s0 + $0x21] sm:$0xff]  }
   0x4   :  { %26 = vst [vmem:[%s70_s1 + $0x12] sm:$0xff] %v25_v3   ;;  %28 = vst [vmem:[%s70_s1 + $0x1a] sm:$0xff] %v27_v4  }

// kernel: _lambda_.1
= control target key start
LH: loop header
LB: loop body
LE: loop exit
PB: predicated region body
PF: predicated region fallthrough
CT: control target
= control target key end

     0   :  { %v291_v0 = vmov 0.0   ;;  %vm292_vm0 = vmmov 0   ;;  %s373_s1 = inlined_call_operand.vmem [shape: bf16[128,128], index: 1, kind: input, shape index: {}]   ;;  %s374_s0 = inlined_call_operand.vmem [shape: bf16[34,128], index: 0, kind: input, shape index: {}]   ;;  %s375_s2 = inlined_call_operand.vmem [shape: f32[34,128], index: 2, kind: input, shape index: {}]   ;;  %s376_s3 = inlined_call_operand.vmem [shape: bf16[34,128], index: 3, kind: output, shape index: {}]  }
   0x1   :  { %234 = vmatprep.subr.bf16.mxu0 %v291_v0  ;;  %262 = vmatprep.subr.bf16.mxu1 %v291_v0  ;;  %v280_v1 = vld [vmem:[%s373_s1 + $0x38] sm:$0xff]   ;;  %v281_v2 = vld [vmem:[%s373_s1 + $0x30] sm:$0xff]   ;;  %v282_v3 = vld [vmem:[%s373_s1 + $0x28] sm:$0xff]  }
   0x2   :  { %250 = vmatprep.mubr.msk.bf16.mxu0 %vm292_vm0, %v291_v0  ;;  %254 = vmatprep.mubr.msk.bf16.mxu1 %vm292_vm0, %v291_v0  ;;  %v283_v4 = vld [vmem:[%s373_s1 + $0x20] sm:$0xff]   ;;  %v284_v5 = vld [vmem:[%s373_s1 + $0x18] sm:$0xff]   ;;  %v285_v6 = vld [vmem:[%s373_s1 + $0x10] sm:$0xff]  }
   0x3   :  { %235 = vmatpush3.bf16.msra.mxu0 %v280_v1  ;;  %270 = vmatpush3.bf16.msra.mxu1 %v280_v1  ;;  %v286_v7 = vld [vmem:[%s373_s1 + $0x8] sm:$0xff]   ;;  %v287_v8 = vld [vmem:[%s373_s1] sm:$0xff]   ;;  %v290_v11 = vld [vmem:[%s374_s0 + $0x10] ss:$0 sps:$4 sm:$0x11]  }
   0x4   :  { %236 = vmatprep.subr.bf16.mxu0 %v291_v0  ;;  %263 = vmatprep.subr.bf16.mxu1 %v291_v0  ;;  %v288_v9 = vld [vmem:[%s374_s0] sm:$0xff]   ;;  %v289_v10 = vld [vmem:[%s374_s0 + $0x8] sm:$0xff]   ;;  %v38_v15 = vld [vmem:[%s375_s2 + $0x10] sm:$0xff] }
   0x5   :  { %v36_v12 = vld [vmem:[%s375_s2] sm:$0xff]  ;;  %v37_v18 = vld [vmem:[%s375_s2 + $0x8] sm:$0xff]  ;;  %v39_v19 = vld [vmem:[%s375_s2 + $0x18] sm:$0xff] }
   0x6   :  { %v40_v28 = vld [vmem:[%s375_s2 + $0x20] sm:$0x3] }
   0x7   :  { %237 = vmatpush3.bf16.msra.mxu0 %v281_v2  ;;  %271 = vmatpush3.bf16.msra.mxu1 %v281_v2 }
   0x8   :  { %238 = vmatprep.subr.bf16.mxu0 %v291_v0  ;;  %264 = vmatprep.subr.bf16.mxu1 %v291_v0 }
   0xb   :  { %239 = vmatpush3.bf16.msra.mxu0 %v282_v3  ;;  %272 = vmatpush3.bf16.msra.mxu1 %v282_v3 }
   0xc   :  { %240 = vmatprep.subr.bf16.mxu0 %v291_v0  ;;  %265 = vmatprep.subr.bf16.mxu1 %v291_v0 }
   0xf   :  { %241 = vmatpush3.bf16.msra.mxu0 %v283_v4  ;;  %273 = vmatpush3.bf16.msra.mxu1 %v283_v4 }
  0x10   :  { %242 = vmatprep.subr.bf16.mxu0 %v291_v0  ;;  %266 = vmatprep.subr.bf16.mxu1 %v291_v0 }
  0x13   :  { %243 = vmatpush3.bf16.msra.mxu0 %v284_v5  ;;  %274 = vmatpush3.bf16.msra.mxu1 %v284_v5 }
  0x14   :  { %244 = vmatprep.subr.bf16.mxu0 %v291_v0  ;;  %267 = vmatprep.subr.bf16.mxu1 %v291_v0 }
  0x17   :  { %245 = vmatpush3.bf16.msra.mxu0 %v285_v6  ;;  %275 = vmatpush3.bf16.msra.mxu1 %v285_v6 }
  0x18   :  { %246 = vmatprep.subr.bf16.mxu0 %v291_v0  ;;  %268 = vmatprep.subr.bf16.mxu1 %v291_v0 }
  0x1b   :  { %247 = vmatpush3.bf16.msra.mxu0 %v286_v7  ;;  %276 = vmatpush3.bf16.msra.mxu1 %v286_v7 }
  0x1c   :  { %248 = vmatprep.subr.bf16.mxu0 %v291_v0  ;;  %269 = vmatprep.subr.bf16.mxu1 %v291_v0 }
  0x1f   :  { %249 = vmatpush3.bf16.msra.mxu0 %v287_v8  ;;  %277 = vmatpush3.bf16.msra.mxu1 %v287_v8 }
  0x22   :  { %251 = vmatmul.mubr.bf16.vlgmr.msra.gmra.mxu0 %v288_v9  ;;  %255 = vmatmul.mubr.bf16.vlgmr.msra.gmra.mxu1 %v289_v10 }
  0x23   :  { %258 = vmatprep.mubr.msk.bf16.mxu1 %vm292_vm0, %v291_v0 }
  0x2a   :  { %259 = vmatmul.mubr.bf16.gmra.mxu1 %v290_v11 }
  0xe2   :  { %v139_v13 = vpop.f32.mrf.mxu0  ;;  %v147_v14 = vpop.f32.mrf.mxu1 }
  0xe3   :  { %v140_v20 = vadd.f32 %v139_v13, %v36_v12  ;;  %v148_v23 = vadd.f32 %v147_v14, %v38_v15 }
  0xe4   :  { %v252_v16 = vpop.f32.mrf.mxu0  ;;  %v256_v17 = vpop.f32.mrf.mxu1 }
  0xe6   :  { %v142_v21 = vpop.f32.mrf.mxu0  ;;  %v150_v22 = vpop.f32.mrf.mxu1 }
  0xe7   :  { %v143_v24 = vadd.f32 %v142_v21, %v37_v18  ;;  %v151_v25 = vadd.f32 %v150_v22, %v39_v19 }
  0xe8   :  { %v253_v26 = vpop.f32.mrf.mxu0  ;;  %v257_v27 = vpop.f32.mrf.mxu1 }
  0xe9   :  { %v215_v29 = vpack.c.bf16 %v143_v24, %v140_v20  ;;  %v220_v30 = vpack.c.bf16 %v151_v25, %v148_v23 }
  0xea   :  { %v155_v31 = vpop.f32.mrf.mxu1 }
  0xeb   :  { %216 = vst [vmem:[%s376_s3] sm:$0xff] %v215_v29   ;;  %222 = vst [vmem:[%s376_s3 + $0x8] sm:$0xff] %v220_v30   ;;  %v156_v32 = vadd.f32 %v155_v31, %v40_v28 }
  0xec   :  { %v260_v33 = vpop.f32.mrf.mxu1 }
  0xed   :  { %v211_v34 = vpack.c.bf16 %v156_v32, %v156_v32 }
  0xee   :  { %v158_v35 = vpop.f32.mrf.mxu1 }
  0xef   :  { %186 = vst [vmem:[%s376_s3 + $0x10] sm:$0x1] %v211_v34 }
  0xf0   :  { %v261_v36 = vpop.f32.mrf.mxu1 }

</bundles_post_ra>
